<compile_context>
chip_gen: v5e
topology: v5e:2x2
jax: 0.10.0
libtpu: 0.0.40
codegen_flags: <defaults>
</compile_context>

<pallas_src>
import functools

import jax
import jax.numpy as jnp
from jax.experimental import pallas as pl
from jax.experimental.pallas import tpu as pltpu


_ACTIVATIONS = {
    # nn.GELU default is the exact (erf) form -> approximate=False.
    "GELU": functools.partial(jax.nn.gelu, approximate=False),
    "SELU": jax.nn.selu,
    "CELU": jax.nn.celu,
    "RELU": jax.nn.relu,
    "ELU": jax.nn.elu,
    "TANH": jnp.tanh,
    "SIGMOID": jax.nn.sigmoid,
}

_BN_EPS = 1e-5


def _pinn_kernel(x_ref, w_ref, bn_ref, w_out_ref, b_out_ref, out_ref, *,
                 n_hidden: int, activation: str, use_bf16_matmul: bool):
    """Whole-MLP kernel, all operands VMEM-resident.

    x_ref    : (batch, K)            input, zero-padded to K = hidden width
    w_ref    : (n_hidden, K, H)      hidden Linear weights (layer 0 zero-padded)
    bn_ref   : (2*n_hidden, H)       rows [gamma_0, beta_0, gamma_1, beta_1, ...]
    w_out_ref: (H, out_dim)
    b_out_ref: (1, out_dim)
    out_ref  : (batch, out_dim)
    """
    act = _ACTIVATIONS[activation]

    def mxu_dot(a, b):
        if use_bf16_matmul:
            a = a.astype(jnp.bfloat16)
            b = b.astype(jnp.bfloat16)
        return jnp.dot(a, b, preferred_element_type=jnp.float32)

    bn = bn_ref[...]                      # single small tile, loaded once
    h = x_ref[...].astype(jnp.float32)

    for i in range(n_hidden):
        # Linear (bias folded out -- exact under BatchNorm training mode).
        z = mxu_dot(h, w_ref[i])
        # BatchNorm1d (training mode, biased variance) fused with the affine:
        #   scale = gamma * rsqrt(var + eps); shift = beta - mean * scale
        mean = jnp.mean(z, axis=0, keepdims=True)
        mean_sq = jnp.mean(z * z, axis=0, keepdims=True)
        var = jnp.maximum(mean_sq - mean * mean, 0.0)   # guard tiny negatives
        gamma = bn[2 * i:2 * i + 1, :]
        beta = bn[2 * i + 1:2 * i + 2, :]
        scale = gamma * jax.lax.rsqrt(var + _BN_EPS)    # rsqrt -> EUP slot
        shift = beta - mean * scale
        h = act(z * scale + shift)                      # one FMA + activation

    y = mxu_dot(h, w_out_ref[...]) + b_out_ref[...]
    out_ref[...] = y.astype(out_ref.dtype)


def pinn_forward(x, w_stack, bn_stack, w_out, b_out, activation,
                 use_bf16_matmul=False):
    """Run the PINN forward pass as one Pallas call (all operands in VMEM)."""
    batch, in_dim = x.shape
    n_hidden, k, hidden = w_stack.shape
    out_dim = w_out.shape[1]
    assert in_dim <= k, "input width must not exceed the padded hidden width"

    if in_dim < k:
        # Zero-pad features so layer-0's weight fits the (n_hidden, K, H) stack.
        x = jnp.pad(x, ((0, 0), (0, k - in_dim)))

    kernel = functools.partial(
        _pinn_kernel,
        n_hidden=n_hidden,
        activation=activation,
        use_bf16_matmul=use_bf16_matmul,
    )

    vmem_spec = pl.BlockSpec(memory_space=pltpu.MemorySpace.VMEM)

    return pl.pallas_call(
        kernel,
        out_shape=jax.ShapeDtypeStruct((batch, out_dim), jnp.float32),
        in_specs=[vmem_spec] * 5,
        out_specs=vmem_spec,
    )(x, w_stack, bn_stack, w_out, b_out)


def init_pinn_params(key, layers):
    """Deterministic parameter init matching the PyTorch module's shapes.

    Linear weights: xavier_uniform_ (stored transposed as (in, out)).
    Hidden Linear biases are omitted: they cancel exactly under BatchNorm1d
    in training mode and never affect the forward output.
    BatchNorm1d: gamma=1, beta=0.
    Output Linear bias: PyTorch default uniform(-1/sqrt(fan_in), 1/sqrt(fan_in)).
    """
    in_dim = layers[0]
    hidden = layers[1]
    out_dim = layers[-1]
    n_hidden = len(layers) - 2
    layer_sizes = [in_dim] + n_hidden * [hidden]
    k = hidden  # padded input width of the stacked hidden weights

    w_list = []
    for a, b in zip(layer_sizes[:-1], layer_sizes[1:]):
        key, kw = jax.random.split(key)
        bound_w = (6.0 / (a + b)) ** 0.5
        w = jax.random.uniform(kw, (a, b), jnp.float32, -bound_w, bound_w)
        if a < k:
            w = jnp.pad(w, ((0, k - a), (0, 0)))  # zero rows: no effect on x@W
        w_list.append(w)
    w_stack = jnp.stack(w_list, axis=0)                      # (n_hidden, K, H)

    # Interleaved [gamma_0, beta_0, gamma_1, beta_1, ...] -> one VMEM tile.
    bn_stack = jnp.tile(
        jnp.stack([jnp.ones((hidden,), jnp.float32),
                   jnp.zeros((hidden,), jnp.float32)], axis=0),
        (n_hidden, 1),
    )                                                        # (2*n_hidden, H)

    a, b = hidden, out_dim
    key, kw, kb = jax.random.split(key, 3)
    bound_w = (6.0 / (a + b)) ** 0.5
    w_out = jax.random.uniform(kw, (a, b), jnp.float32, -bound_w, bound_w)
    bound_b = 1.0 / (a ** 0.5)
    b_out = jax.random.uniform(kb, (1, b), jnp.float32, -bound_b, bound_b)

    return w_stack, bn_stack, w_out, b_out


def pinn_forward_ref(x, w_stack, bn_stack, w_out, b_out, activation):
    """Pure-JAX reference for the same forward pass (correctness check)."""
    act = _ACTIVATIONS[activation]
    n_hidden, k, hidden = w_stack.shape
    in_dim = x.shape[1]
    h = jnp.pad(x.astype(jnp.float32), ((0, 0), (0, k - in_dim)))
    for i in range(n_hidden):
        z = h @ w_stack[i]
        mean = jnp.mean(z, axis=0, keepdims=True)
        var = jnp.mean((z - mean) ** 2, axis=0, keepdims=True)
        gamma = bn_stack[2 * i:2 * i + 1, :]
        beta = bn_stack[2 * i + 1:2 * i + 2, :]
        h = act((z - mean) / jnp.sqrt(var + _BN_EPS) * gamma + beta)
    return h @ w_out + b_out


if __name__ == "__main__":
    # Small PINN: 8 input features, two hidden layers of 32, 2 outputs (delta, omega).
    layers = [8, 32, 32, 2]
    activation = "TANH"
    batch = 16

    key = jax.random.PRNGKey(0)
    key, kx = jax.random.split(key)
    x = jax.random.normal(kx, (batch, layers[0]), dtype=jnp.float32)

    w_stack, bn_stack, w_out, b_out = init_pinn_params(key, layers)

    y = pinn_forward(x, w_stack, bn_stack, w_out, b_out, activation)
    y = jax.block_until_ready(y)

    y_ref = pinn_forward_ref(x, w_stack, bn_stack, w_out, b_out, activation)
    assert y.shape == (batch, layers[-1])
    assert jnp.allclose(y, y_ref, atol=1e-4, rtol=1e-4), \
        "Pallas output mismatch vs JAX reference"

    print("KERNEL_OK")
</pallas_src>

<mosaic_0001>
module attributes {stable_mosaic.version = 11 : i64} {
  func.func @_pinn_kernel(%arg0: memref<16x32xf32, #tpu.memory_space<vmem>>, %arg1: memref<2x32x32xf32, #tpu.memory_space<vmem>>, %arg2: memref<4x32xf32, #tpu.memory_space<vmem>>, %arg3: memref<32x2xf32, #tpu.memory_space<vmem>>, %arg4: memref<1x2xf32, #tpu.memory_space<vmem>>, %arg5: memref<16x2xf32, #tpu.memory_space<vmem>>) attributes {dimension_semantics = [], scalar_prefetch = 0 : i64, scratch_operands = 0 : i64, tpu.core_type = #tpu.core_type<tc>} {
    %c0 = arith.constant 0 : index
    %c0_0 = arith.constant 0 : index
    %0 = vector.load %arg2[%c0, %c0_0] : memref<4x32xf32, #tpu.memory_space<vmem>>, vector<4x32xf32>
    %c0_1 = arith.constant 0 : index
    %c0_2 = arith.constant 0 : index
    %1 = vector.load %arg0[%c0_1, %c0_2] : memref<16x32xf32, #tpu.memory_space<vmem>>, vector<16x32xf32>
    %c0_3 = arith.constant 0 : index
    %c0_4 = arith.constant 0 : index
    %c0_5 = arith.constant 0 : index
    %2 = vector.load %arg1[%c0_3, %c0_4, %c0_5] : memref<2x32x32xf32, #tpu.memory_space<vmem>>, vector<1x32x32xf32>
    %3 = vector.shape_cast %2 : vector<1x32x32xf32> to vector<32x32xf32>
    %cst = arith.constant dense<0.000000e+00> : vector<16x32xf32>
    %4 = tpu.matmul %1, %3, %cst {dimension_numbers = #tpu.dot_dimension_numbers<[1], [0], [0], [1], [0, 0, 1, 1], [], []>} : vector<16x32xf32>, vector<32x32xf32>, vector<16x32xf32> -> vector<16x32xf32>
    %cst_6 = arith.constant dense<0.000000e+00> : vector<32xf32>
    %5 = vector.multi_reduction <add>, %4, %cst_6 [0] : vector<16x32xf32> to vector<32xf32>
    %6 = vector.shape_cast %5 : vector<32xf32> to vector<1x32xf32>
    %cst_7 = arith.constant 1.600000e+01 : f32
    %7 = vector.broadcast %cst_7 : f32 to vector<1x32xf32>
    %8 = arith.divf %6, %7 : vector<1x32xf32>
    %9 = arith.mulf %4, %4 : vector<16x32xf32>
    %cst_8 = arith.constant dense<0.000000e+00> : vector<32xf32>
    %10 = vector.multi_reduction <add>, %9, %cst_8 [0] : vector<16x32xf32> to vector<32xf32>
    %11 = vector.shape_cast %10 : vector<32xf32> to vector<1x32xf32>
    %cst_9 = arith.constant 1.600000e+01 : f32
    %12 = vector.broadcast %cst_9 : f32 to vector<1x32xf32>
    %13 = arith.divf %11, %12 : vector<1x32xf32>
    %14 = arith.mulf %8, %8 : vector<1x32xf32>
    %15 = arith.subf %13, %14 : vector<1x32xf32>
    %cst_10 = arith.constant 0.000000e+00 : f32
    %16 = vector.broadcast %cst_10 : f32 to vector<1x32xf32>
    %17 = arith.maximumf %15, %16 : vector<1x32xf32>
    %18 = vector.extract_strided_slice %0 {offsets = [0, 0], sizes = [1, 32], strides = [1, 1]} : vector<4x32xf32> to vector<1x32xf32>
    %19 = vector.extract_strided_slice %0 {offsets = [1, 0], sizes = [1, 32], strides = [1, 1]} : vector<4x32xf32> to vector<1x32xf32>
    %cst_11 = arith.constant 9.99999974E-6 : f32
    %20 = vector.broadcast %cst_11 : f32 to vector<1x32xf32>
    %21 = arith.addf %17, %20 : vector<1x32xf32>
    %22 = math.rsqrt %21 : vector<1x32xf32>
    %23 = arith.mulf %18, %22 : vector<1x32xf32>
    %24 = arith.mulf %8, %23 : vector<1x32xf32>
    %25 = arith.subf %19, %24 : vector<1x32xf32>
    %26 = vector.broadcast %23 : vector<1x32xf32> to vector<16x32xf32>
    %27 = arith.mulf %4, %26 : vector<16x32xf32>
    %28 = vector.broadcast %25 : vector<1x32xf32> to vector<16x32xf32>
    %29 = arith.addf %27, %28 : vector<16x32xf32>
    %30 = math.tanh %29 : vector<16x32xf32>
    %c1 = arith.constant 1 : index
    %c0_12 = arith.constant 0 : index
    %c0_13 = arith.constant 0 : index
    %31 = vector.load %arg1[%c1, %c0_12, %c0_13] : memref<2x32x32xf32, #tpu.memory_space<vmem>>, vector<1x32x32xf32>
    %32 = vector.shape_cast %31 : vector<1x32x32xf32> to vector<32x32xf32>
    %cst_14 = arith.constant dense<0.000000e+00> : vector<16x32xf32>
    %33 = tpu.matmul %30, %32, %cst_14 {dimension_numbers = #tpu.dot_dimension_numbers<[1], [0], [0], [1], [0, 0, 1, 1], [], []>} : vector<16x32xf32>, vector<32x32xf32>, vector<16x32xf32> -> vector<16x32xf32>
    %cst_15 = arith.constant dense<0.000000e+00> : vector<32xf32>
    %34 = vector.multi_reduction <add>, %33, %cst_15 [0] : vector<16x32xf32> to vector<32xf32>
    %35 = vector.shape_cast %34 : vector<32xf32> to vector<1x32xf32>
    %cst_16 = arith.constant 1.600000e+01 : f32
    %36 = vector.broadcast %cst_16 : f32 to vector<1x32xf32>
    %37 = arith.divf %35, %36 : vector<1x32xf32>
    %38 = arith.mulf %33, %33 : vector<16x32xf32>
    %cst_17 = arith.constant dense<0.000000e+00> : vector<32xf32>
    %39 = vector.multi_reduction <add>, %38, %cst_17 [0] : vector<16x32xf32> to vector<32xf32>
    %40 = vector.shape_cast %39 : vector<32xf32> to vector<1x32xf32>
    %cst_18 = arith.constant 1.600000e+01 : f32
    %41 = vector.broadcast %cst_18 : f32 to vector<1x32xf32>
    %42 = arith.divf %40, %41 : vector<1x32xf32>
    %43 = arith.mulf %37, %37 : vector<1x32xf32>
    %44 = arith.subf %42, %43 : vector<1x32xf32>
    %cst_19 = arith.constant 0.000000e+00 : f32
    %45 = vector.broadcast %cst_19 : f32 to vector<1x32xf32>
    %46 = arith.maximumf %44, %45 : vector<1x32xf32>
    %47 = vector.extract_strided_slice %0 {offsets = [2, 0], sizes = [1, 32], strides = [1, 1]} : vector<4x32xf32> to vector<1x32xf32>
    %48 = vector.extract_strided_slice %0 {offsets = [3, 0], sizes = [1, 32], strides = [1, 1]} : vector<4x32xf32> to vector<1x32xf32>
    %cst_20 = arith.constant 9.99999974E-6 : f32
    %49 = vector.broadcast %cst_20 : f32 to vector<1x32xf32>
    %50 = arith.addf %46, %49 : vector<1x32xf32>
    %51 = math.rsqrt %50 : vector<1x32xf32>
    %52 = arith.mulf %47, %51 : vector<1x32xf32>
    %53 = arith.mulf %37, %52 : vector<1x32xf32>
    %54 = arith.subf %48, %53 : vector<1x32xf32>
    %55 = vector.broadcast %52 : vector<1x32xf32> to vector<16x32xf32>
    %56 = arith.mulf %33, %55 : vector<16x32xf32>
    %57 = vector.broadcast %54 : vector<1x32xf32> to vector<16x32xf32>
    %58 = arith.addf %56, %57 : vector<16x32xf32>
    %59 = math.tanh %58 : vector<16x32xf32>
    %c0_21 = arith.constant 0 : index
    %c0_22 = arith.constant 0 : index
    %60 = vector.load %arg3[%c0_21, %c0_22] : memref<32x2xf32, #tpu.memory_space<vmem>>, vector<32x2xf32>
    %cst_23 = arith.constant dense<0.000000e+00> : vector<16x2xf32>
    %61 = tpu.matmul %59, %60, %cst_23 {dimension_numbers = #tpu.dot_dimension_numbers<[1], [0], [0], [1], [0, 0, 1, 1], [], []>} : vector<16x32xf32>, vector<32x2xf32>, vector<16x2xf32> -> vector<16x2xf32>
    %c0_24 = arith.constant 0 : index
    %c0_25 = arith.constant 0 : index
    %62 = vector.load %arg4[%c0_24, %c0_25] : memref<1x2xf32, #tpu.memory_space<vmem>>, vector<1x2xf32>
    %63 = vector.broadcast %62 : vector<1x2xf32> to vector<16x2xf32>
    %64 = arith.addf %61, %63 : vector<16x2xf32>
    %c0_26 = arith.constant 0 : index
    %c0_27 = arith.constant 0 : index
    %65 = vector.load %arg5[%c0_26, %c0_27] : memref<16x2xf32, #tpu.memory_space<vmem>>, vector<16x2xf32>
    tpu.vector_store %arg5[%c0_26, %c0_27], %64 {strides = array<i32>} : memref<16x2xf32, #tpu.memory_space<vmem>>, vector<16x2xf32>,
    return
  }
}

</mosaic_0001>

<bundles_post_ra>
// kernel: tpu_custom_call.1
= control target key start
LH: loop header
LB: loop body
LE: loop exit
PB: predicated region body
PF: predicated region fallthrough
CT: control target
= control target key end

     0   :  { %10 = vsyncpa [#allocation3], 0  ;;  %s314_s21 = smov [#allocation2]   ;;  %s315_s23 = smov 128   ;;  %s407_s0 = inlined_call_operand.vmem [shape: f32[16,32], index: 0, kind: input, shape index: {}]   ;;  %s408_s1 = inlined_call_operand.hbm [shape: f32[2,32,32], index: 1, kind: input, shape index: {}]   ;;  %s409_s2 = inlined_call_operand.vmem [shape: f32[4,32], index: 2, kind: input, shape index: {}]   ;;  %s410_s3 = inlined_call_operand.vmem [shape: f32[32,2], index: 3, kind: input, shape index: {}]   ;;  %s411_s4 = inlined_call_operand.vmem [shape: f32[1,2], index: 4, kind: input, shape index: {}]   ;;  %s412_s5 = inlined_call_operand.vmem [shape: f32[16,2], index: 5, kind: output, shape index: {}]  }
   0x1   :  { %s17_s20 = sshll.u32 %s408_s1, 4  ;;  %s19_s22 = sshll.u32 %s314_s21, 4  ;;  %s18_s20 = int_to_ptr.hbm [resolvable:$true] %s17_s20  ;;  %s20_s22 = int_to_ptr.vmem [resolvable:$true] %s19_s22 }
   0x2   :  { %s316_s24 = smov 8  }
   0x3   :  { %25 = dma.hbm_to_vmem [thread:$0]  %s18_s20, 1024, %s20_s22, [#allocation3], %s315_s23, %s315_s23, %s316_s24  }
   0x4   :  { %312 = dma.done.wait [#allocation3], 1024  }
   0x5   :  { %313 = vsyncadd [#allocation3], 4294966272  ;;  %v42_v0 = vld [vmem:[#allocation2 + $0x18] sm:$0xff]  ;;  %v41_v1 = vld [vmem:[#allocation2 + $0x10] sm:$0xff]  ;;  %vm43_vm0 = vcmask 261120   ;;  %v317_v6 = vmov 16.0  }
   0x6   :  { %265 = vmatpush.msra.mxu3 %v42_v0  ;;  %62 = vmatpush.msra.mxu0 %v42_v0  ;;  %v40_v2 = vld [vmem:[#allocation2 + $0x8] sm:$0xff]  ;;  %v39_v3 = vld [vmem:[#allocation2] sm:$0xff]  ;;  %274 = vrcp.f32 %v317_v6  ;;  %v134_v41 = vld [vmem:[#allocation2 + $0x38] sm:$0xff]  ;;  %vm251_vm8 = vcmask 15360  }
   0x7   :  { %v38_v4 = vld [vmem:[%s407_s0 + $0x8] sm:$0xff]  ;;  %v37_v5 = vld [vmem:[%s407_s0] sm:$0xff]  ;;  %153 = vmatpush.msra.mxu1 %v134_v41  ;;  %v133_v42 = vld [vmem:[#allocation2 + $0x30] sm:$0xff] }
   0x8   :  { %266 = vmatpush.msra.mxu3 %v41_v1  ;;  %63 = vmatpush.msra.mxu0 %v41_v1  ;;  %v132_v43 = vld [vmem:[#allocation2 + $0x28] sm:$0xff]  ;;  %v131_v44 = vld [vmem:[#allocation2 + $0x20] sm:$0xff] }
   0x9   :  { %154 = vmatpush.msra.mxu1 %v133_v42  ;;  %v370_v50 = vld [vmem:[%s409_s2] sm:$0xf] }
   0xa   :  { %267 = vmatpush.msra.mxu3 %v40_v2  ;;  %64 = vmatpush.msra.mxu0 %v40_v2 }
   0xb   :  { %155 = vmatpush.msra.mxu1 %v132_v43 }
   0xc   :  { %268 = vmatpush.msra.mxu3 %v39_v3  ;;  %65 = vmatpush.msra.mxu0 %v39_v3  ;;  %v275_v7 = vpop.eup %274 }
   0xd   :  { %260 = vmatmul.msk.f32.vlgmr.msra.gmra.mxu3 %vm43_vm0, %v38_v4  ;;  %259 = vmatmul.msk.f32.vlgmr.msra.gmra.mxu0 %vm43_vm0, %v37_v5  ;;  %v83_v10 = vmul.f32 16.0, %v275_v7  ;;  %vm87_vm1 = vweird.f32 %v275_v7 }
   0xe   :  { %156 = vmatpush.msra.mxu1 %v131_v44 }
   0xf   :  { %v84_v15 = vsub.f32 1.0, %v83_v10 }
  0x11   :  { %v85_v21 = vmul.f32 %v275_v7, %v84_v15 }
  0x13   :  { %v86_v26 = vadd.f32 %v275_v7, %v85_v21 }
  0x15   :  { %v363_v31 = vsel %vm87_vm1, %v275_v7, %v86_v26 }
  0x8a   :  { %v67_v8 = vpop.f32.mrf.mxu0 }
  0x8b   :  { %v90_v9 = vmul.f32 %v67_v8, %v67_v8  ;;  %v73_v11 = vsel %vm43_vm0, %v67_v8, 0.0 }
  0x8d   :  { %v92_v13 = vsel %vm43_vm0, %v90_v9, 0.0 }
  0x90   :  { %v70_v12 = vpop.f32.mrf.mxu3 }
  0x91   :  { %v74_v14 = vsel %vm43_vm0, %v70_v12, 0.0  ;;  %v91_v16 = vmul.f32 %v70_v12, %v70_v12 }
  0x92   :  { %v75_v17 = vadd.f32 %v74_v14, %v73_v11 }
  0x93   :  { %v93_v18 = vsel %vm43_vm0, %v91_v16, 0.0 }
  0x94   :  { %v76_v19 = vrot.slane %v75_v17, 4  ;;  %v94_v20 = vadd.f32 %v93_v18, %v92_v13 }
  0x96   :  { %v77_v22 = vadd.f32 %v76_v19, %v75_v17  ;;  %v95_v23 = vrot.slane %v94_v20, 4 }
  0x98   :  { %v78_v24 = vrot.slane %v77_v22, 2  ;;  %v96_v25 = vadd.f32 %v95_v23, %v94_v20 }
  0x9a   :  { %v79_v27 = vadd.f32 %v78_v24, %v77_v22  ;;  %v97_v28 = vrot.slane %v96_v25, 2 }
  0x9c   :  { %v80_v29 = vrot.slane %v79_v27, 1  ;;  %v98_v30 = vadd.f32 %v97_v28, %v96_v25 }
  0x9e   :  { %v81_v32 = vadd.f32 %v80_v29, %v79_v27  ;;  %v99_v33 = vrot.slane %v98_v30, 1  ;;  %v217_v29 = vld [vmem:[%s410_s3 + $0x18] sm:$0xff] }
  0x9f   :  { %240 = vmatpush.msra.mxu2 %v217_v29 }
  0xa0   :  { %v89_v34 = vmul.f32 %v363_v31, %v81_v32  ;;  %v100_v35 = vadd.f32 %v99_v33, %v98_v30  ;;  %v216_v30 = vld [vmem:[%s410_s3 + $0x10] sm:$0xff]  ;;  %v215_v32 = vld [vmem:[%s410_s3 + $0x8] sm:$0xff] }
  0xa1   :  { %241 = vmatpush.msra.mxu2 %v216_v30 }
  0xa2   :  { %v101_v36 = vmul.f32 %v100_v35, %v363_v31  ;;  %v102_v37 = vmul.f32 %v89_v34, %v89_v34 }
  0xa3   :  { %242 = vmatpush.msra.mxu2 %v215_v32 }
  0xa4   :  { %v103_v38 = vsub.f32 %v101_v36, %v102_v37 }
  0xa6   :  { %v104_v39 = vmax.f32 %v103_v38, 0.0 }
  0xa8   :  { %v105_v40 = vadd.f32 1e-05, %v104_v39 }
  0xaa   :  { %276 = vrsqrt.f32 %v105_v40  ;;  %vm112_vm3 = vweird.f32 %v105_v40 }
  0xb0   :  { %v277_v45 = vpop.eup %276 }
  0xb1   :  { %v107_v46 = vmul.f32 %v277_v45, %v105_v40  ;;  %vm113_vm2 = vweird.f32 %v277_v45 }
  0xb2   :  { %vm114_vm4 = vmor %vm112_vm3, %vm113_vm2 }
  0xb3   :  { %v108_v47 = vmul.f32 %v277_v45, %v107_v46 }
  0xb5   :  { %v109_v48 = vmul.f32 0.5, %v108_v47 }
  0xb7   :  { %v110_v49 = vsub.f32 1.5, %v109_v48 }
  0xb9   :  { %v111_v51 = vmul.f32 %v277_v45, %v110_v49 }
  0xbb   :  { %v115_v52 = vsel %vm114_vm4, %v277_v45, %v111_v51 }
  0xbc   :  { %v116_v53 = vmul.f32 %v115_v52, %v370_v50 }
  0xbe   :  { %v117_v54 = vmul.f32 %v116_v53, %v89_v34  ;;  %v122_v56 = vperm.slane %v116_v53, 0  ;;  %v273_v53 = vld [vmem:[%s411_s4] ss:$0 sm:$0xff] }
  0xc0   :  { %v119_v55 = vrot.slane %v117_v54, 7  ;;  %v123_v58 = vmul.f32 %v122_v56, %v67_v8  ;;  %v124_v61 = vmul.f32 %v122_v56, %v70_v12 }
  0xc2   :  { %v121_v57 = vsub.f32 %v370_v50, %v119_v55 }
  0xc4   :  { %v125_v59 = vperm.slane %v121_v57, 1 }
  0xc6   :  { %v126_v60 = vadd.f32 %v125_v59, %v123_v58  ;;  %v127_v62 = vadd.f32 %v125_v59, %v124_v61 }
  0xc8   :  { %278 = vtanh.f32 %v126_v60 }
  0xc9   :  { %280 = vtanh.f32 %v127_v62 }
  0xce   :  { %v279_v63 = vpop.eup %278 }
  0xcf   :  { %261 = vmatmul.msk.f32.vlgmr.msra.gmra.mxu1 %vm43_vm0, %v279_v63  ;;  %v281_v0 = vpop.eup %280 }
  0xd7   :  { %262 = vmatmul.msk.f32.gmra.mxu1 %vm43_vm0, %v281_v0 }
 0x14c   :  { %v158_v1 = vpop.f32.mrf.mxu1 }
 0x14d   :  { %v174_v2 = vmul.f32 %v158_v1, %v158_v1  ;;  %v164_v4 = vsel %vm43_vm0, %v158_v1, 0.0 }
 0x14f   :  { %v176_v8 = vsel %vm43_vm0, %v174_v2, 0.0 }
 0x154   :  { %v161_v3 = vpop.f32.mrf.mxu1 }
 0x155   :  { %v165_v5 = vsel %vm43_vm0, %v161_v3, 0.0  ;;  %v175_v6 = vmul.f32 %v161_v3, %v161_v3 }
 0x156   :  { %v166_v7 = vadd.f32 %v165_v5, %v164_v4 }
 0x157   :  { %v177_v9 = vsel %vm43_vm0, %v175_v6, 0.0 }
 0x158   :  { %v167_v10 = vrot.slane %v166_v7, 4  ;;  %v178_v11 = vadd.f32 %v177_v9, %v176_v8 }
 0x15a   :  { %v168_v12 = vadd.f32 %v167_v10, %v166_v7  ;;  %v179_v13 = vrot.slane %v178_v11, 4 }
 0x15c   :  { %v169_v14 = vrot.slane %v168_v12, 2  ;;  %v180_v15 = vadd.f32 %v179_v13, %v178_v11 }
 0x15e   :  { %v170_v16 = vadd.f32 %v169_v14, %v168_v12  ;;  %v181_v17 = vrot.slane %v180_v15, 2 }
 0x160   :  { %v171_v18 = vrot.slane %v170_v16, 1  ;;  %v182_v19 = vadd.f32 %v181_v17, %v180_v15 }
 0x162   :  { %v172_v20 = vadd.f32 %v171_v18, %v170_v16  ;;  %v183_v21 = vrot.slane %v182_v19, 1 }
 0x164   :  { %v173_v22 = vmul.f32 %v172_v20, %v363_v31  ;;  %v184_v23 = vadd.f32 %v183_v21, %v182_v19 }
 0x166   :  { %v185_v24 = vmul.f32 %v184_v23, %v363_v31  ;;  %v186_v25 = vmul.f32 %v173_v22, %v173_v22  ;;  %v214_v31 = vld [vmem:[%s410_s3] sm:$0xff] }
 0x167   :  { %243 = vmatpush.msra.mxu2 %v214_v31 }
 0x168   :  { %v187_v26 = vsub.f32 %v185_v24, %v186_v25 }
 0x16a   :  { %v188_v27 = vmax.f32 %v187_v26, 0.0 }
 0x16c   :  { %v189_v28 = vadd.f32 1e-05, %v188_v27 }
 0x16e   :  { %282 = vrsqrt.f32 %v189_v28  ;;  %vm196_vm6 = vweird.f32 %v189_v28 }
 0x174   :  { %v283_v33 = vpop.eup %282 }
 0x175   :  { %v191_v34 = vmul.f32 %v283_v33, %v189_v28  ;;  %vm197_vm5 = vweird.f32 %v283_v33 }
 0x176   :  { %vm198_vm7 = vmor %vm196_vm6, %vm197_vm5 }
 0x177   :  { %v192_v35 = vmul.f32 %v283_v33, %v191_v34 }
 0x179   :  { %v193_v36 = vmul.f32 0.5, %v192_v35 }
 0x17b   :  { %v194_v37 = vsub.f32 1.5, %v193_v36 }
 0x17d   :  { %v195_v38 = vmul.f32 %v283_v33, %v194_v37 }
 0x17f   :  { %v199_v39 = vsel %vm198_vm7, %v283_v33, %v195_v38 }
 0x180   :  { %v200_v40 = vmul.f32 %v199_v39, %v370_v50 }
 0x182   :  { %v201_v41 = vmul.f32 %v200_v40, %v173_v22  ;;  %v206_v43 = vperm.slane %v200_v40, 2 }
 0x184   :  { %v203_v42 = vrot.slane %v201_v41, 7  ;;  %v207_v45 = vmul.f32 %v206_v43, %v158_v1  ;;  %v208_v48 = vmul.f32 %v206_v43, %v161_v3 }
 0x186   :  { %v205_v44 = vsub.f32 %v370_v50, %v203_v42 }
 0x188   :  { %v209_v46 = vperm.slane %v205_v44, 3 }
 0x18a   :  { %v210_v47 = vadd.f32 %v209_v46, %v207_v45  ;;  %v211_v49 = vadd.f32 %v209_v46, %v208_v48 }
 0x18c   :  { %284 = vtanh.f32 %v210_v47 }
 0x18d   :  { %286 = vtanh.f32 %v211_v49 }
 0x192   :  { %v285_v51 = vpop.eup %284 }
 0x193   :  { %263 = vmatmul.msk.f32.vlgmr.msra.gmra.mxu2 %vm43_vm0, %v285_v51  ;;  %v287_v52 = vpop.eup %286 }
 0x19b   :  { %264 = vmatmul.msk.f32.gmra.mxu2 %vm43_vm0, %v287_v52 }
 0x216   :  { %v245_v54 = vpop.f32.mrf.mxu2 }
 0x217   :  { %v246_v50 = vadd.f32 %v273_v53, %v245_v54 }
 0x219   :  { %252 = vst.msk [vmem:[%s412_s5] sm:$0xff] %vm251_vm8, %v246_v50 }
 0x21e   :  { %v248_v55 = vpop.f32.mrf.mxu2 }
 0x21f   :  { %v249_v56 = vadd.f32 %v273_v53, %v248_v55 }
 0x221   :  { %253 = vst.msk [vmem:[%s412_s5 + $0x8] sm:$0xff] %vm251_vm8, %v249_v56 }
 0x222   :  { %258 = vsyncpa [#allocation3], 1 }

</bundles_post_ra>
